<compile_context>
chip_gen: v7x
topology: tpu7x:2x2x1
jax: 0.10.0
libtpu: 0.0.40
codegen_flags: <defaults>
</compile_context>

<pallas_src>
import functools

import jax
import jax.numpy as jnp
from jax import lax
from jax.experimental import pallas as pl
from jax.experimental.pallas import tpu as pltpu


def _round_up(x, m):
    return ((x + m - 1) // m) * m


def _vmem_capacity_bytes():
    try:
        info = pltpu.get_tpu_info()
        cap = getattr(info, "vmem_capacity_bytes", None)
        if cap:
            return int(cap)
    except Exception:
        pass
    return 64 * 1024 * 1024  # conservative fallback (v7x per-TC VMEM)


def _vmem_bytes(rt, Dp, tn, x_bytes, out_bytes, w_resident):
    """Rough per-step VMEM footprint estimate for tile selection."""
    w = Dp * tn * 2 * (1 if w_resident else 2)      # bf16 W (double-buffered if streamed)
    xb = 2 * rt * Dp * x_bytes                      # double-buffered x blocks
    ob = 2 * rt * tn * out_bytes                    # double-buffered out blocks
    par = 3 * Dp * 4 + 2 * tn * 4                   # gamma / beta / bias
    tmp = 2 * rt * Dp * 4 + rt * tn * 4             # in-kernel f32 temporaries (x, y, acc)
    return w + xb + ob + par + tmp


def _select_tiling(Dp, x_bytes, out_bytes, budget, *, row_tile=None, col_tile=None):
    """Returns (row_tile, col_tile); col_tile=None means whole W resident (single slab)."""
    row_cands = [row_tile] if row_tile is not None else [1024, 512, 256, 128, 64, 32, 16, 8]
    if col_tile is None:
        # Preferred path: whole bf16 W resident in VMEM, biggest row tile that fits.
        for rt in row_cands:
            if _vmem_bytes(rt, Dp, Dp, x_bytes, out_bytes, True) <= budget:
                return rt, None
        col_cands = [1024, 512, 256, 128]
    else:
        col_cands = [col_tile]
    for tn in col_cands:
        if tn > Dp:
            continue
        for rt in row_cands:
            if _vmem_bytes(rt, Dp, tn, x_bytes, out_bytes, False) <= budget:
                return rt, tn
    return row_cands[-1], min(col_cands[-1], Dp)


def _prenorm_linear_kernel(x_ref, gamma_ref, beta_ref, w_ref, b_ref, o_ref, *, inv_d):
    # x_ref: (rt, Dp)   gamma/beta: (1, Dp)   w_ref: (Dp, tn)   b_ref: (1, tn)   o_ref: (rt, tn)
    x = x_ref[...].astype(jnp.float32)

    # --- one-pass LayerNorm statistics (padded feature lanes are zero, inv_d = 1/D) ---
    s1 = jnp.sum(x, axis=-1, keepdims=True)
    s2 = jnp.sum(x * x, axis=-1, keepdims=True)
    mean = s1 * inv_d
    var = jnp.maximum(s2 * inv_d - mean * mean, 0.0)   # guard E[x^2]-mean^2 cancellation
    inv = lax.rsqrt(var + 1e-5)
    # Padded lanes have gamma = beta = 0 -> y = 0 there, so padded W rows are inert.
    y = (x - mean) * (inv * gamma_ref[...]) + beta_ref[...]

    # --- fn = Linear(dim, dim): bf16 operands on the MXU, f32 accumulator ---
    out = jnp.dot(y.astype(jnp.bfloat16), w_ref[...], preferred_element_type=jnp.float32)

    # --- bias in the epilogue; DropPath = identity (eval mode) ---
    o_ref[...] = (out + b_ref[...]).astype(o_ref.dtype)


def prenorm_prepare_params(gamma, beta, w, b):
    """One-time parameter preprocessing, hoisted out of the per-call path:
    pad to lane-dense Dp (multiple of 128) and cast W to bf16 for the MXU."""
    D = w.shape[0]
    Dp = _round_up(D, 128)
    pad = Dp - D
    f32 = jnp.float32
    return {
        "dim": D,
        "gamma": jnp.pad(gamma.astype(f32), (0, pad)).reshape(1, Dp),
        "beta": jnp.pad(beta.astype(f32), (0, pad)).reshape(1, Dp),
        "bias": jnp.pad(b.astype(f32), (0, pad)).reshape(1, Dp),
        "w": jnp.pad(w.astype(jnp.bfloat16), ((0, pad), (0, pad))),
    }


def prenorm_forward(x, params, *, row_tile=None, col_tile=None):
    """x: (B, N, D). Returns DropPath(Linear(LayerNorm(x))) with DropPath = identity (eval)."""
    B, N, D = x.shape
    assert D == params["dim"]
    Dp = params["w"].shape[0]
    if row_tile is not None:
        assert row_tile % 8 == 0, "row_tile must be a multiple of 8"
    if col_tile is not None:
        assert col_tile % 128 == 0, "col_tile must be a multiple of 128"

    R = B * N
    x2 = x.reshape(R, D)
    if Dp != D:
        # Feature pad only (lane-dense); rows are NOT padded -- Pallas masks the
        # partial boundary row-block instead.
        x2 = jnp.pad(x2, ((0, 0), (0, Dp - D)))

    cap = _vmem_capacity_bytes()
    budget = int(cap * 0.70)                       # headroom for Mosaic internal scratch
    vmem_limit = max(32 * 1024 * 1024, int(cap * 0.85))

    rt, tn = _select_tiling(Dp, x2.dtype.itemsize, x.dtype.itemsize, budget,
                            row_tile=row_tile, col_tile=col_tile)
    if row_tile is None:
        rt = min(rt, _round_up(R, 8))              # don't allocate tiles bigger than the problem
    nrow = pl.cdiv(R, rt)

    kernel = functools.partial(_prenorm_linear_kernel, inv_d=1.0 / D)
    # Small params live whole in VMEM: loaded once, never re-streamed per grid step.
    const_spec = pl.BlockSpec(memory_space=pltpu.MemorySpace.VMEM)

    if tn is None:
        # --- Path A: whole bf16 W resident, 1-D row grid ---
        out = pl.pallas_call(
            kernel,
            out_shape=jax.ShapeDtypeStruct((R, Dp), x.dtype),
            grid_spec=pltpu.PrefetchScalarGridSpec(
                num_scalar_prefetch=0,
                grid=(nrow,),
                in_specs=[
                    pl.BlockSpec((rt, Dp), lambda i: (i, 0)),   # x rows (pipelined)
                    const_spec,                                  # gamma (1, Dp) f32
                    const_spec,                                  # beta  (1, Dp) f32
                    const_spec,                                  # W     (Dp, Dp) bf16
                    const_spec,                                  # bias  (1, Dp) f32
                ],
                out_specs=pl.BlockSpec((rt, Dp), lambda i: (i, 0)),
            ),
            compiler_params=pltpu.CompilerParams(
                dimension_semantics=("parallel",),
                vmem_limit_bytes=vmem_limit,
            ),
        )(x2, params["gamma"], params["beta"], params["w"], params["bias"])
    else:
        # --- Path B: large D -- column-tiled W. Column axis is OUTER so each (Dp, tn)
        # W slab is DMA'd once and stays across all row steps. ---
        ncol = pl.cdiv(Dp, tn)
        out = pl.pallas_call(
            kernel,
            out_shape=jax.ShapeDtypeStruct((R, Dp), x.dtype),
            grid_spec=pltpu.PrefetchScalarGridSpec(
                num_scalar_prefetch=0,
                grid=(ncol, nrow),
                in_specs=[
                    pl.BlockSpec((rt, Dp), lambda j, i: (i, 0)),   # x rows
                    const_spec,                                     # gamma (1, Dp)
                    const_spec,                                     # beta  (1, Dp)
                    pl.BlockSpec((Dp, tn), lambda j, i: (0, j)),    # W column slab
                    pl.BlockSpec((1, tn), lambda j, i: (0, j)),     # bias slab
                ],
                out_specs=pl.BlockSpec((rt, tn), lambda j, i: (i, j)),
            ),
            compiler_params=pltpu.CompilerParams(
                dimension_semantics=("arbitrary", "parallel"),
                vmem_limit_bytes=vmem_limit,
            ),
        )(x2, params["gamma"], params["beta"], params["w"], params["bias"])

    if Dp != D:
        out = out[:, :D]
    return out.reshape(B, N, D)


def prenorm_reference(x, gamma, beta, w, b):
    """Pure-JAX reference matching the kernel's mixed precision
    (f32 LayerNorm, bf16 matmul operands, f32 accumulation)."""
    xf = x.astype(jnp.float32)
    mean = jnp.mean(xf, axis=-1, keepdims=True)
    var = jnp.mean((xf - mean) ** 2, axis=-1, keepdims=True)
    xn = (xf - mean) * lax.rsqrt(var + 1e-5)
    y = xn * gamma + beta
    y_q = y.astype(jnp.bfloat16).astype(jnp.float32)
    w_q = w.astype(jnp.bfloat16).astype(jnp.float32)
    out = jnp.einsum("bnd,de->bne", y_q, w_q) + b
    return out.astype(x.dtype)


def _run_case(key, B, N, D, row_tile=None, col_tile=None,
              x_dtype=jnp.float32, atol=1e-2, rtol=1e-2):
    k_x, k_g, k_b, k_w, k_bias = jax.random.split(key, 5)
    x = jax.random.normal(k_x, (B, N, D), dtype=jnp.float32).astype(x_dtype)
    gamma = 1.0 + 0.1 * jax.random.normal(k_g, (D,), dtype=jnp.float32)
    beta = 0.1 * jax.random.normal(k_b, (D,), dtype=jnp.float32)
    w = jax.random.normal(k_w, (D, D), dtype=jnp.float32) / jnp.sqrt(D)
    bias = 0.1 * jax.random.normal(k_bias, (D,), dtype=jnp.float32)

    # One-time (hoisted) parameter preprocessing; reused across forward calls.
    params = prenorm_prepare_params(gamma, beta, w, bias)

    out = jax.block_until_ready(
        prenorm_forward(x, params, row_tile=row_tile, col_tile=col_tile))
    ref = prenorm_reference(x, gamma, beta, w, bias)
    assert out.shape == (B, N, D) and out.dtype == x.dtype
    assert jnp.allclose(out.astype(jnp.float32), ref.astype(jnp.float32),
                        atol=atol, rtol=rtol), f"mismatch vs reference ({B},{N},{D})"


if __name__ == "__main__":
    key = jax.random.PRNGKey(0)
    k0, k1, k2, k3 = jax.random.split(key, 4)

    # 1) Module-consistent small shape: batch=2, seq=8, hidden dim=32
    #    (feature-pad path + a single partial row block, no row padding).
    _run_case(k0, B=2, N=8, D=32)

    # 2) Lane-aligned dim, several row-grid steps and a masked partial last row block.
    _run_case(k1, B=2, N=200, D=128, row_tile=128)

    # 3) Forced output-column tiling (the large-D / v7x path), exercised at a small shape.
    _run_case(k2, B=2, N=40, D=256, row_tile=64, col_tile=128)

    # 4) bf16 activations in / bf16 out (halves x + out HBM traffic); LN math stays f32.
    _run_case(k3, B=2, N=64, D=128, x_dtype=jnp.bfloat16, atol=5e-2, rtol=2e-2)

    print("KERNEL_OK")
</pallas_src>

<mosaic_0001>
module attributes {stable_mosaic.version = 11 : i64} {
  func.func @_prenorm_linear_kernel(%arg0: i32, %arg1: memref<16x128xf32, #tpu.memory_space<vmem>>, %arg2: memref<1x128xf32, #tpu.memory_space<vmem>>, %arg3: memref<1x128xf32, #tpu.memory_space<vmem>>, %arg4: memref<128x128xbf16, #tpu.memory_space<vmem>>, %arg5: memref<1x128xf32, #tpu.memory_space<vmem>>, %arg6: memref<16x128xf32, #tpu.memory_space<vmem>>) attributes {dimension_semantics = [#tpu.dimension_semantics<parallel>], iteration_bounds = array<i64: 1>, scalar_prefetch = 0 : i64, scratch_operands = 0 : i64, tpu.core_type = #tpu.core_type<tc>, window_params = [{transform_indices = @transform_0, window_bounds = array<i64: 16, 128>}, {pipeline_mode = #tpu.pipeline_mode<synchronous>, transform_indices = @transform_1, window_bounds = array<i64: 1, 128>}, {pipeline_mode = #tpu.pipeline_mode<synchronous>, transform_indices = @transform_2, window_bounds = array<i64: 1, 128>}, {pipeline_mode = #tpu.pipeline_mode<synchronous>, transform_indices = @transform_3, window_bounds = array<i64: 128, 128>}, {pipeline_mode = #tpu.pipeline_mode<synchronous>, transform_indices = @transform_4, window_bounds = array<i64: 1, 128>}, {transform_indices = @transform_5, window_bounds = array<i64: 16, 128>}]} {
    %c0 = arith.constant 0 : index
    %c0_0 = arith.constant 0 : index
    %0 = vector.load %arg1[%c0, %c0_0] : memref<16x128xf32, #tpu.memory_space<vmem>>, vector<16x128xf32>
    %cst = arith.constant dense<0.000000e+00> : vector<16xf32>
    %1 = vector.multi_reduction <add>, %0, %cst [1] : vector<16x128xf32> to vector<16xf32>
    %2 = vector.shape_cast %1 : vector<16xf32> to vector<16x1xf32>
    %3 = arith.mulf %0, %0 : vector<16x128xf32>
    %cst_1 = arith.constant dense<0.000000e+00> : vector<16xf32>
    %4 = vector.multi_reduction <add>, %3, %cst_1 [1] : vector<16x128xf32> to vector<16xf32>
    %5 = vector.shape_cast %4 : vector<16xf32> to vector<16x1xf32>
    %cst_2 = arith.constant 3.125000e-02 : f32
    %6 = vector.broadcast %cst_2 : f32 to vector<16x1xf32>
    %7 = arith.mulf %2, %6 : vector<16x1xf32>
    %cst_3 = arith.constant 3.125000e-02 : f32
    %8 = vector.broadcast %cst_3 : f32 to vector<16x1xf32>
    %9 = arith.mulf %5, %8 : vector<16x1xf32>
    %10 = arith.mulf %7, %7 : vector<16x1xf32>
    %11 = arith.subf %9, %10 : vector<16x1xf32>
    %cst_4 = arith.constant 0.000000e+00 : f32
    %12 = vector.broadcast %cst_4 : f32 to vector<16x1xf32>
    %13 = arith.maximumf %11, %12 : vector<16x1xf32>
    %cst_5 = arith.constant 9.99999974E-6 : f32
    %14 = vector.broadcast %cst_5 : f32 to vector<16x1xf32>
    %15 = arith.addf %13, %14 : vector<16x1xf32>
    %16 = math.rsqrt %15 : vector<16x1xf32>
    %17 = vector.broadcast %7 : vector<16x1xf32> to vector<16x128xf32>
    %18 = arith.subf %0, %17 : vector<16x128xf32>
    %c0_6 = arith.constant 0 : index
    %c0_7 = arith.constant 0 : index
    %19 = vector.load %arg2[%c0_6, %c0_7] : memref<1x128xf32, #tpu.memory_space<vmem>>, vector<1x128xf32>
    %20 = vector.broadcast %16 : vector<16x1xf32> to vector<16x128xf32>
    %21 = vector.broadcast %19 : vector<1x128xf32> to vector<16x128xf32>
    %22 = arith.mulf %20, %21 : vector<16x128xf32>
    %23 = arith.mulf %18, %22 : vector<16x128xf32>
    %c0_8 = arith.constant 0 : index
    %c0_9 = arith.constant 0 : index
    %24 = vector.load %arg3[%c0_8, %c0_9] : memref<1x128xf32, #tpu.memory_space<vmem>>, vector<1x128xf32>
    %25 = vector.broadcast %24 : vector<1x128xf32> to vector<16x128xf32>
    %26 = arith.addf %23, %25 : vector<16x128xf32>
    %27 = arith.truncf %26 : vector<16x128xf32> to vector<16x128xbf16>
    %c0_10 = arith.constant 0 : index
    %c0_11 = arith.constant 0 : index
    %28 = vector.load %arg4[%c0_10, %c0_11] : memref<128x128xbf16, #tpu.memory_space<vmem>>, vector<128x128xbf16>
    %cst_12 = arith.constant dense<0.000000e+00> : vector<16x128xf32>
    %29 = tpu.matmul %27, %28, %cst_12 {dimension_numbers = #tpu.dot_dimension_numbers<[1], [0], [0], [1], [0, 0, 1, 1], [], []>} : vector<16x128xbf16>, vector<128x128xbf16>, vector<16x128xf32> -> vector<16x128xf32>
    %c0_13 = arith.constant 0 : index
    %c0_14 = arith.constant 0 : index
    %30 = vector.load %arg5[%c0_13, %c0_14] : memref<1x128xf32, #tpu.memory_space<vmem>>, vector<1x128xf32>
    %31 = vector.broadcast %30 : vector<1x128xf32> to vector<16x128xf32>
    %32 = arith.addf %29, %31 : vector<16x128xf32>
    %c0_15 = arith.constant 0 : index
    %c0_16 = arith.constant 0 : index
    %33 = vector.load %arg6[%c0_15, %c0_16] : memref<16x128xf32, #tpu.memory_space<vmem>>, vector<16x128xf32>
    tpu.vector_store %arg6[%c0_15, %c0_16], %32 {strides = array<i32>} : memref<16x128xf32, #tpu.memory_space<vmem>>, vector<16x128xf32>,
    return
  }
  func.func @transform_0(%arg0: i32) -> (i32, i32) {
    %c0_i32 = arith.constant 0 : i32
    %c0_i32_0 = arith.constant 0 : i32
    return %arg0, %c0_i32 : i32, i32
  }
  func.func @transform_1(%arg0: i32) -> (i32, i32) {
    %c0_i32 = arith.constant 0 : i32
    %c0_i32_0 = arith.constant 0 : i32
    %c0_i32_1 = arith.constant 0 : i32
    return %c0_i32, %c0_i32_0 : i32, i32
  }
  func.func @transform_2(%arg0: i32) -> (i32, i32) {
    %c0_i32 = arith.constant 0 : i32
    %c0_i32_0 = arith.constant 0 : i32
    %c0_i32_1 = arith.constant 0 : i32
    return %c0_i32, %c0_i32_0 : i32, i32
  }
  func.func @transform_3(%arg0: i32) -> (i32, i32) {
    %c0_i32 = arith.constant 0 : i32
    %c0_i32_0 = arith.constant 0 : i32
    %c0_i32_1 = arith.constant 0 : i32
    return %c0_i32, %c0_i32_0 : i32, i32
  }
  func.func @transform_4(%arg0: i32) -> (i32, i32) {
    %c0_i32 = arith.constant 0 : i32
    %c0_i32_0 = arith.constant 0 : i32
    %c0_i32_1 = arith.constant 0 : i32
    return %c0_i32, %c0_i32_0 : i32, i32
  }
  func.func @transform_5(%arg0: i32) -> (i32, i32) {
    %c0_i32 = arith.constant 0 : i32
    %c0_i32_0 = arith.constant 0 : i32
    return %arg0, %c0_i32 : i32, i32
  }
}

</mosaic_0001>

<bundles_post_ra>
// kernel: tpu_custom_call.1
= control target key start
LH: loop header
LB: loop body
LE: loop exit
PB: predicated region body
PF: predicated region fallthrough
CT: control target
= control target key end

     0   :  { %10 = vsyncpa [#allocation3], 0  ;;  %s454_s0 = inlined_call_operand.hbm [shape: f32[16,128], index: 0, kind: input, shape index: {}]   ;;  %s455_s1 = inlined_call_operand.vmem [shape: f32[1,128], index: 1, kind: input, shape index: {}]   ;;  %s456_s2 = inlined_call_operand.vmem [shape: f32[1,128], index: 2, kind: input, shape index: {}]   ;;  %s457_s3 = inlined_call_operand.hbm [shape: bf16[128,128], index: 3, kind: input, shape index: {}]   ;;  %s458_s4 = inlined_call_operand.vmem [shape: f32[1,128], index: 4, kind: input, shape index: {}]   ;;  %s459_s5 = inlined_call_operand.hbm [shape: f32[16,128], index: 5, kind: output, shape index: {}]  }
   0x1   :  { %11 = vsyncpa [#allocation6], 0 }
   0x2   :  { %12 = vsyncpa [#allocation4], 0  ;;  %s364_s18 = smov [#allocation2]   ;;  %s292_s22 = scalar_lea.hbm %s454_s0, 256 }
   0x3   :  { %s18_s19 = sshll.u32 %s364_s18, 4  ;;  %p293_p0 = scmp.ne.s32.totalorder %s454_s0, %s292_s22  ;;  %s19_s19 = int_to_ptr.vmem [resolvable:$true] %s18_s19 }
   0x4   :  { %p296_p1 = scmp.lt.u32.totalorder %s292_s22, %s454_s0 }
   0x6   :  { %p298_p2 = pnand %p296_p1, %p293_p0 }
   0x8   :  { %301 = shalt.err (!%p298_p2)
}
   0x9   :  { %s302_s27 = scalar_lea.vmem %s19_s19, 256  ;;  %p307_p4 = scmp.lt.s32.totalorder %s19_s19, %s19_s19 }
   0xa   :  { %p303_p3 = scmp.ne.s32.totalorder %s19_s19, %s302_s27  ;;  %p308_p5 = scmp.lt.s32.totalorder %s302_s27, %s302_s27 }
   0xc   :  { %p309_p6 = por %p308_p5, %p307_p4 }
   0xe   :  { %p310_p7 = pnand %p309_p6, %p303_p3 }
  0x10   :  { %313 = shalt.err (!%p310_p7)
}
  0x11   :  { %s365_s28 = smov 128   ;;  %s366_s29 = smov 8  }
  0x12   :  { %24 = dma.hbm_to_vmem [thread:$0]  %s454_s0, 256, %s19_s19, [#allocation3], %s365_s28, %s365_s28, %s366_s29  }
  0x13   :  { %s367_s7 = smov [#allocation5]   ;;  %s314_s11 = scalar_lea.hbm %s457_s3, 1024 }
  0x14   :  { %s34_s8 = sshll.u32 %s367_s7, 4  ;;  %p315_p8 = scmp.ne.s32.totalorder %s457_s3, %s314_s11  ;;  %s35_s8 = int_to_ptr.vmem [resolvable:$true] %s34_s8 }
  0x15   :  { %p318_p9 = scmp.lt.u32.totalorder %s314_s11, %s457_s3 }
  0x17   :  { %p320_p10 = pnand %p318_p9, %p315_p8 }
  0x19   :  { %323 = shalt.err (!%p320_p10)
}
  0x1a   :  { %s324_s16 = scalar_lea.vmem %s35_s8, 1024  ;;  %p329_p12 = scmp.lt.s32.totalorder %s35_s8, %s35_s8 }
  0x1b   :  { %p325_p11 = scmp.ne.s32.totalorder %s35_s8, %s324_s16  ;;  %p330_p13 = scmp.lt.s32.totalorder %s324_s16, %s324_s16 }
  0x1d   :  { %p331_p0 = por %p330_p13, %p329_p12 }
  0x1f   :  { %p332_p1 = pnand %p331_p0, %p325_p11 }
  0x21   :  { %335 = shalt.err (!%p332_p1)
}
  0x22   :  { %s368_s0 = smov 64   ;;  %s369_s17 = smov 4  }
  0x23   :  { %40 = dma.hbm_to_vmem [thread:$0]  %s457_s3, 1024, %s35_s8, [#allocation6], %s368_s0, %s368_s0, %s369_s17  }
  0x24   :  { %358 = dma.done.wait [#allocation3], 256  }
  0x25   :  { %359 = vsyncadd [#allocation3], 4294967040 }
  0x26   :  { %360 = dma.done.wait [#allocation6], 1024  }
  0x27   :  { %361 = vsyncadd [#allocation6], 4294966272  ;;  %v50_v0 = vld [vmem:[#allocation2] sm:$0xff]  ;;  %v51_v1 = vld [vmem:[#allocation2 + $0x8] sm:$0xff]  ;;  %v370_v5 = vmov 0.0   ;;  %vm371_vm0 = vmmov 0  }
  0x28   :  { %52 = vadd.xlane.f32.xlu0 %v50_v0  ;;  %v56_v2 = vmul.f32 %v50_v0, %v50_v0  ;;  %v57_v3 = vmul.f32 %v51_v1, %v51_v1  ;;  %v280_v4 = vld [vmem:[#allocation5] sm:$0xff]   ;;  %251 = vmatprep.subr.bf16.mxu0 %v370_v5  ;;  %v281_v6 = vld [vmem:[#allocation5 + $0x8] sm:$0xff]   ;;  %v282_v7 = vld [vmem:[#allocation5 + $0x10] sm:$0xff]  }
  0x29   :  { %252 = vmatpush3.bf16.msra.mxu0 %v280_v4  ;;  %v283_v8 = vld [vmem:[#allocation5 + $0x18] sm:$0xff]   ;;  %v284_v9 = vld [vmem:[#allocation5 + $0x20] sm:$0xff]   ;;  %267 = vmatprep.mubr.msk.bf16.mxu0 %vm371_vm0, %v370_v5  ;;  %v285_v10 = vld [vmem:[#allocation5 + $0x28] sm:$0xff]  }
  0x2a   :  { %58 = vadd.xlane.f32.xlu1 %v56_v2  ;;  %253 = vmatprep.subr.bf16.mxu0 %v370_v5  ;;  %v286_v11 = vld [vmem:[#allocation5 + $0x30] sm:$0xff]   ;;  %v287_v12 = vld [vmem:[#allocation5 + $0x38] sm:$0xff]  }
  0x2b   :  { %v231_v29 = vld [vmem:[%s455_s1] ss:$0 sm:$0xff]  ;;  %s372_s1 = smov [#allocation7]  }
  0x2c   :  { %54 = vadd.xlane.f32.xlu0 %v51_v1  ;;  %v232_v37 = vld [vmem:[%s456_s2] ss:$0 sm:$0xff]  ;;  %s218_s25 = sshll.u32 %s372_s1, 4  ;;  %s219_s25 = int_to_ptr.vmem [resolvable:$true] %s218_s25 }
  0x2d   :  { %254 = vmatpush3.bf16.msra.mxu0 %v281_v6  ;;  %v233_v42 = vld [vmem:[%s458_s4] ss:$0 sm:$0xff]  ;;  %s336_s2 = scalar_lea.vmem %s219_s25, 256  ;;  %p341_p3 = scmp.lt.s32.totalorder %s219_s25, %s219_s25 }
  0x2e   :  { %60 = vadd.xlane.f32.xlu1 %v57_v3  ;;  %255 = vmatprep.subr.bf16.mxu0 %v370_v5  ;;  %p337_p2 = scmp.ne.s32.totalorder %s219_s25, %s336_s2  ;;  %p342_p4 = scmp.lt.s32.totalorder %s336_s2, %s336_s2 }
  0x30   :  { %p343_p5 = por %p342_p4, %p341_p3 }
  0x31   :  { %256 = vmatpush3.bf16.msra.mxu0 %v282_v7 }
  0x32   :  { %257 = vmatprep.subr.bf16.mxu0 %v370_v5  ;;  %p344_p6 = pnand %p343_p5, %p337_p2 }
  0x35   :  { %258 = vmatpush3.bf16.msra.mxu0 %v283_v8 }
  0x36   :  { %259 = vmatprep.subr.bf16.mxu0 %v370_v5 }
  0x39   :  { %260 = vmatpush3.bf16.msra.mxu0 %v284_v9 }
  0x3a   :  { %261 = vmatprep.subr.bf16.mxu0 %v370_v5 }
  0x3d   :  { %262 = vmatpush3.bf16.msra.mxu0 %v285_v10 }
  0x3e   :  { %263 = vmatprep.subr.bf16.mxu0 %v370_v5 }
  0x41   :  { %264 = vmatpush3.bf16.msra.mxu0 %v286_v11 }
  0x42   :  { %265 = vmatprep.subr.bf16.mxu0 %v370_v5 }
  0x45   :  { %266 = vmatpush3.bf16.msra.mxu0 %v287_v12 }
  0xb5   :  { %v53_v13 = vpop.xlane.xlu0 %52 }
  0xb6   :  { %v62_v14 = vmul.f32 0.03125, %v53_v13 }
  0xb7   :  { %v59_v15 = vpop.xlane.xlu1 %58 }
  0xb8   :  { %v66_v16 = vmul.f32 %v62_v14, %v62_v14  ;;  %v64_v17 = vmul.f32 0.03125, %v59_v15  ;;  %v76_v32 = vsub.f32 %v50_v0, %v62_v14 }
  0xb9   :  { %v55_v18 = vpop.xlane.xlu0 %54 }
  0xba   :  { %v68_v19 = vsub.f32 %v64_v17, %v66_v16  ;;  %v63_v20 = vmul.f32 0.03125, %v55_v18 }
  0xbb   :  { %v61_v21 = vpop.xlane.xlu1 %60 }
  0xbc   :  { %v70_v22 = vmax.f32 %v68_v19, 0.0  ;;  %v67_v23 = vmul.f32 %v63_v20, %v63_v20  ;;  %v65_v24 = vmul.f32 0.03125, %v61_v21  ;;  %v77_v34 = vsub.f32 %v51_v1, %v63_v20 }
  0xbe   :  { %v72_v25 = vadd.f32 1e-05, %v70_v22  ;;  %v69_v26 = vsub.f32 %v65_v24, %v67_v23 }
  0xc0   :  { %288 = vrsqrt.f32 %v72_v25  ;;  %v71_v27 = vmax.f32 %v69_v26, 0.0 }
  0xc2   :  { %v73_v28 = vadd.f32 1e-05, %v71_v27 }
  0xc4   :  { %290 = vrsqrt.f32 %v73_v28 }
  0xca   :  { %v289_v30 = vpop.eup %288 }
  0xcb   :  { %v85_v31 = vmul.f32 %v289_v30, %v231_v29 }
  0xcd   :  { %v87_v36 = vmul.f32 %v85_v31, %v76_v32 }
  0xce   :  { %v291_v33 = vpop.eup %290 }
  0xcf   :  { %v86_v35 = vmul.f32 %v291_v33, %v231_v29  ;;  %v96_v39 = vadd.f32 %v232_v37, %v87_v36 }
  0xd1   :  { %v88_v38 = vmul.f32 %v86_v35, %v77_v34 }
  0xd3   :  { %v97_v40 = vadd.f32 %v232_v37, %v88_v38 }
  0xd5   :  { %v98_v41 = vpack.c.bf16 %v97_v40, %v96_v39 }
  0xd7   :  { %268 = vmatmul.mubr.bf16.vlgmr.msra.gmra.mrb[0].mxu0 %v98_v41 }
 0x1aa   :  { %v204_v43 = vpop.f32.mrb[0].mxu0 }
 0x1ab   :  { %v205_v44 = vadd.f32 %v233_v42, %v204_v43  ;;  %v269_v45 = vpop.f32.mrb[1].mxu0 }
 0x1ac   :  { %v207_v46 = vpop.f32.mrb[2].mxu0 }
 0x1ad   :  { %211 = vst [vmem:[#allocation7] sm:$0xff] %v205_v44  ;;  %v208_v47 = vadd.f32 %v233_v42, %v207_v46  ;;  %v270_v48 = vpop.f32.mrb[3].mxu0 }
 0x1af   :  { %212 = vst [vmem:[#allocation7 + $0x8] sm:$0xff] %v208_v47 }
 0x1b0   :  { %347 = shalt.err (!%p344_p6)
}
 0x1b1   :  { %s348_s27 = scalar_lea.hbm %s459_s5, 256 }
 0x1b2   :  { %p349_p7 = scmp.ne.s32.totalorder %s459_s5, %s348_s27  ;;  %p352_p8 = scmp.lt.u32.totalorder %s348_s27, %s459_s5 }
 0x1b4   :  { %p354_p9 = pnand %p352_p8, %p349_p7 }
 0x1b6   :  { %357 = shalt.err (!%p354_p9)
}
 0x1b7   :  { %224 = dma.vmem_to_hbm [thread:$0]  %s219_s25, 256, %s459_s5, [#allocation4], %s365_s28, %s365_s28, %s366_s29  }
 0x1b8   :  { %362 = dma.done.wait [#allocation4], 256  }
 0x1b9   :  { %363 = vsyncadd [#allocation4], 4294967040 }
 0x1ba   :  { %228 = vsyncpa [#allocation3], 1 }
 0x1bb   :  { %229 = vsyncpa [#allocation6], 1 }
 0x1bc   :  { %230 = vsyncpa [#allocation4], 1 }

</bundles_post_ra>
